<compile_context>
chip_gen: v7x
topology: tpu7x:2x2x1
jax: 0.10.0
libtpu: 0.0.40
codegen_flags: <defaults>
</compile_context>

<pallas_src>
import jax
import jax.numpy as jnp
from jax.experimental import pallas as pl
from jax.experimental.pallas import tpu as pltpu

OUT_PAD = 128  # lane-dense padded width of the fc3 weight / accumulator


def _round_up(x, m):
    return (x + m - 1) // m * m


def mlp_kernel(x_ref, w1_ref, b1_ref, w2_ref, b2_ref, w3_ref, b3_ref,
               o_ref, h1_ref, acc_ref):
    """One (batch tile, hidden chunk) grid step.

    grid = (batch_tiles, hidden_chunks). The hidden axis tiles the fc2 *output*
    dimension, so h1 (computed once per batch tile at n == 0) is the resident
    LHS and the fc3 partial products accumulate in acc_ref.
    """
    n = pl.program_id(1)

    @pl.when(n == 0)
    def _():
        h1 = jnp.dot(x_ref[...], w1_ref[...], preferred_element_type=jnp.float32)
        h1 = jnp.maximum(h1 + b1_ref[...], 0.0)
        h1_ref[...] = h1.astype(h1_ref.dtype)
        acc_ref[...] = jnp.zeros_like(acc_ref)

    h2 = jnp.dot(h1_ref[...], w2_ref[...], preferred_element_type=jnp.float32)
    h2 = jnp.maximum(h2 + b2_ref[...], 0.0)
    acc_ref[...] += jnp.dot(h2, w3_ref[...], preferred_element_type=jnp.float32)

    @pl.when(n == pl.num_programs(1) - 1)
    def _():
        res = acc_ref[...] + b3_ref[...]               # (tile_b, OUT_PAD) f32
        res_t = jnp.transpose(res)                     # (OUT_PAD, tile_b) via XLU
        o_ref[...] = res_t[:1, :].astype(o_ref.dtype)  # only the real column


def _tpu_generation():
    try:
        kind = jax.devices()[0].device_kind.lower()
    except Exception:
        return 6
    for g in (7, 6, 5, 4):
        if "v%d" % g in kind:
            return g
    return 6


def _vmem_limit_bytes():
    try:
        cap = int(pltpu.get_tpu_info().vmem_capacity_bytes)
    except Exception:
        cap = 64 * 1024 * 1024  # conservative fallback (v7x physical VMEM)
    # ~96 MiB on 128 MiB chips (v5e/v6e), ~48 MiB on 64 MiB chips (v7x).
    return min((cap * 3) // 4, 100 * 1024 * 1024)


def _choose_tile_b(B, gen):
    b_pad = _round_up(B, 128)  # 128-row padding granularity (bf16 sublane-safe)
    if gen >= 6 and b_pad % 256 == 0 and b_pad >= 512:
        return 256, b_pad      # fill 256-wide MXU, still >= 2 batch grid steps
    return 128, b_pad


def _choose_tile_n(H, d_in, tile_b, vmem_limit):
    """Largest fc2-output tile that keeps weights + activations under the VMEM
    budget. tile_n == H means fully resident (single fused pass, no K-tiling)."""
    budget = (vmem_limit * 7) // 10

    def fits(tn):
        weights = 2 * (d_in * H * 2 + H * tn * 2 + tn * OUT_PAD * 4)  # 2x: worst-case buffering
        acts = 2 * tile_b * d_in * 2 + tile_b * H * 2 + tile_b * OUT_PAD * 4 + 2 * tile_b * 4
        return weights + acts <= budget

    if fits(H) or H % 128 != 0:
        return H
    for tn in range(H - 128, 127, -128):
        if H % tn == 0 and fits(tn):
            return tn
    return 128


def prepare_params(params, compute_dtype=jnp.bfloat16):
    """One-time parameter prep (hoisted out of the per-call forward):
      * fc1/fc2 weights cast to the MXU compute dtype (bf16),
      * fc3 weight/bias zero-padded to OUT_PAD lanes and kept f32 (negligible
        flops, closer to the f32 PyTorch reference),
      * biases kept f32 for the VPU epilogue."""
    H = params["w1"].shape[1]
    w3p = jnp.zeros((H, OUT_PAD), jnp.float32).at[:, :1].set(params["w3"])
    b3p = jnp.zeros((1, OUT_PAD), jnp.float32).at[:, :1].set(params["b3"])
    return {
        "w1": params["w1"].astype(compute_dtype),
        "b1": params["b1"].astype(jnp.float32),
        "w2": params["w2"].astype(compute_dtype),
        "b2": params["b2"].astype(jnp.float32),
        "w3": w3p,
        "b3": b3p,
    }


def mlp_forward(x, prepared, *, tile_n=None, compute_dtype=jnp.bfloat16):
    """Fused MLP forward. x: [B, input_size] f32; prepared = prepare_params(...).
    Returns [B, 1] f32."""
    B, d_in = x.shape
    H = prepared["w1"].shape[1]

    gen = _tpu_generation()
    vmem_limit = _vmem_limit_bytes()
    tile_b, b_pad = _choose_tile_b(B, gen)
    if tile_n is None:
        tile_n = _choose_tile_n(H, d_in, tile_b, vmem_limit)
    else:
        assert H % tile_n == 0 and (tile_n == H or tile_n % 128 == 0), (H, tile_n)

    x_c = x.astype(compute_dtype)
    if b_pad != B:
        x_c = jnp.pad(x_c, ((0, b_pad - B), (0, 0)))

    grid = (b_pad // tile_b, H // tile_n)
    weights_invariant = (tile_n == H)  # only then are w2/b2/w3 grid-invariant
    w1, b1 = prepared["w1"], prepared["b1"]
    w2, b2 = prepared["w2"], prepared["b2"]
    w3, b3 = prepared["w3"], prepared["b3"]

    def run(single_buffer_weights):
        def wspec(shape, index_map, invariant=True):
            # Grid-invariant weights: a single VMEM buffer avoids doubling the
            # resident footprint via the default double-buffering.
            if single_buffer_weights and invariant:
                return pl.BlockSpec(shape, index_map, pipeline_mode=pl.Buffered(1))
            return pl.BlockSpec(shape, index_map)

        return pl.pallas_call(
            mlp_kernel,
            out_shape=jax.ShapeDtypeStruct((1, b_pad), jnp.float32),
            grid=grid,
            in_specs=[
                pl.BlockSpec((tile_b, d_in), lambda i, n: (i, 0)),              # x
                wspec((d_in, H), lambda i, n: (0, 0)),                          # w1
                wspec((1, H), lambda i, n: (0, 0)),                             # b1
                wspec((H, tile_n), lambda i, n: (0, n), weights_invariant),     # w2 chunk
                wspec((1, tile_n), lambda i, n: (0, n), weights_invariant),     # b2 chunk
                wspec((tile_n, OUT_PAD), lambda i, n: (n, 0), weights_invariant),  # w3 chunk (f32)
                wspec((1, OUT_PAD), lambda i, n: (0, 0)),                       # b3 (f32)
            ],
            out_specs=pl.BlockSpec((1, tile_b), lambda i, n: (0, i)),
            scratch_shapes=[
                pltpu.VMEM((tile_b, H), compute_dtype),       # h1 cache (per batch tile)
                pltpu.VMEM((tile_b, OUT_PAD), jnp.float32),   # fc3 accumulator
            ],
            compiler_params=pltpu.CompilerParams(
                dimension_semantics=("parallel", "arbitrary"),
                vmem_limit_bytes=vmem_limit,
            ),
        )(x_c, w1, b1, w2, b2, w3, b3)

    try:
        out_row = run(True)
    except Exception:
        # Installed JAX may reject pl.Buffered(1); fall back to default buffering.
        out_row = run(False)

    return out_row[0, :B].reshape(B, 1)


def init_params(key, input_size, hidden_size):
    """Deterministic init mimicking PyTorch nn.Linear default (uniform +/- 1/sqrt(fan_in)).
    Weights stored transposed: [in_features, out_features]."""
    k1, k2, k3, k4, k5, k6 = jax.random.split(key, 6)

    def lin(kw, kb, fan_in, fan_out):
        bound = 1.0 / jnp.sqrt(fan_in)
        w = jax.random.uniform(kw, (fan_in, fan_out), jnp.float32, -bound, bound)
        b = jax.random.uniform(kb, (1, fan_out), jnp.float32, -bound, bound)
        return w, b

    w1, b1 = lin(k1, k2, input_size, hidden_size)
    w2, b2 = lin(k3, k4, hidden_size, hidden_size)
    w3, b3 = lin(k5, k6, hidden_size, 1)
    return {"w1": w1, "b1": b1, "w2": w2, "b2": b2, "w3": w3, "b3": b3}


def mlp_reference(x, p):
    # Pure f32 reference (matches the PyTorch module's forward).
    h1 = jnp.maximum(x @ p["w1"] + p["b1"], 0.0)
    h2 = jnp.maximum(h1 @ p["w2"] + p["b2"], 0.0)
    return h2 @ p["w3"] + p["b3"]


if __name__ == "__main__":
    key = jax.random.PRNGKey(0)
    k_x, k_p, k_x2, k_p2 = jax.random.split(key, 4)

    # --- Test 1: small shape, fully VMEM-resident weights (single fused pass) ---
    batch, input_size, hidden_size = 8, 32, 32
    x = jax.random.normal(k_x, (batch, input_size), jnp.float32)
    params = init_params(k_p, input_size, hidden_size)
    prepared = prepare_params(params)          # one-time weight prep (not per-call)

    out = jax.block_until_ready(mlp_forward(x, prepared))
    ref = mlp_reference(x, params)
    assert out.shape == (batch, 1), out.shape
    assert jnp.allclose(out, ref, atol=3e-2, rtol=3e-2), (
        "mismatch vs reference", float(jnp.max(jnp.abs(out - ref))))

    # --- Test 2: force the hidden-dim-tiled (accumulator) path ---
    batch2, input2, hidden2 = 16, 64, 512
    x2 = jax.random.normal(k_x2, (batch2, input2), jnp.float32)
    params2 = init_params(k_p2, input2, hidden2)
    prepared2 = prepare_params(params2)

    out2 = jax.block_until_ready(mlp_forward(x2, prepared2, tile_n=256))
    ref2 = mlp_reference(x2, params2)
    assert out2.shape == (batch2, 1), out2.shape
    assert jnp.allclose(out2, ref2, atol=3e-2, rtol=3e-2), (
        "mismatch vs reference (tiled path)", float(jnp.max(jnp.abs(out2 - ref2))))

    print("KERNEL_OK")
</pallas_src>

<mosaic_0001>
module attributes {stable_mosaic.version = 11 : i64} {
  func.func @mlp_kernel(%arg0: i32, %arg1: i32, %arg2: memref<128x32xbf16, #tpu.memory_space<vmem>>, %arg3: memref<32x32xbf16, #tpu.memory_space<vmem>>, %arg4: memref<1x32xf32, #tpu.memory_space<vmem>>, %arg5: memref<32x32xbf16, #tpu.memory_space<vmem>>, %arg6: memref<1x32xf32, #tpu.memory_space<vmem>>, %arg7: memref<32x128xf32, #tpu.memory_space<vmem>>, %arg8: memref<1x128xf32, #tpu.memory_space<vmem>>, %arg9: memref<1x128xf32, #tpu.memory_space<vmem>>, %arg10: memref<128x32xbf16, #tpu.memory_space<vmem>>, %arg11: memref<128x128xf32, #tpu.memory_space<vmem>>) attributes {dimension_semantics = [#tpu.dimension_semantics<parallel>, #tpu.dimension_semantics<arbitrary>], iteration_bounds = array<i64: 1, 1>, scalar_prefetch = 0 : i64, scratch_operands = 2 : i64, tpu.core_type = #tpu.core_type<tc>, window_params = [{transform_indices = @transform_0, window_bounds = array<i64: 128, 32>}, {pipeline_mode = #tpu.pipeline_mode<synchronous>, transform_indices = @transform_1, window_bounds = array<i64: 32, 32>}, {pipeline_mode = #tpu.pipeline_mode<synchronous>, transform_indices = @transform_2, window_bounds = array<i64: 1, 32>}, {pipeline_mode = #tpu.pipeline_mode<synchronous>, transform_indices = @transform_3, window_bounds = array<i64: 32, 32>}, {pipeline_mode = #tpu.pipeline_mode<synchronous>, transform_indices = @transform_4, window_bounds = array<i64: 1, 32>}, {pipeline_mode = #tpu.pipeline_mode<synchronous>, transform_indices = @transform_5, window_bounds = array<i64: 32, 128>}, {pipeline_mode = #tpu.pipeline_mode<synchronous>, transform_indices = @transform_6, window_bounds = array<i64: 1, 128>}, {transform_indices = @transform_7, window_bounds = array<i64: 1, 128>}]} {
    %c0_i32 = arith.constant 0 : i32
    %0 = arith.cmpi eq, %arg1, %c0_i32 : i32
    %1 = arith.extui %0 : i1 to i32
    %c0_i32_0 = arith.constant 0 : i32
    %2 = arith.cmpi ne, %1, %c0_i32_0 : i32
    scf.if %2 {
      %c0_16 = arith.constant 0 : index
      %c0_17 = arith.constant 0 : index
      %19 = vector.load %arg2[%c0_16, %c0_17] : memref<128x32xbf16, #tpu.memory_space<vmem>>, vector<128x32xbf16>
      %c0_18 = arith.constant 0 : index
      %c0_19 = arith.constant 0 : index
      %20 = vector.load %arg3[%c0_18, %c0_19] : memref<32x32xbf16, #tpu.memory_space<vmem>>, vector<32x32xbf16>
      %cst_20 = arith.constant dense<0.000000e+00> : vector<128x32xf32>
      %21 = tpu.matmul %19, %20, %cst_20 {dimension_numbers = #tpu.dot_dimension_numbers<[1], [0], [0], [1], [0, 0, 1, 1], [], []>} : vector<128x32xbf16>, vector<32x32xbf16>, vector<128x32xf32> -> vector<128x32xf32>
      %c0_21 = arith.constant 0 : index
      %c0_22 = arith.constant 0 : index
      %22 = vector.load %arg4[%c0_21, %c0_22] : memref<1x32xf32, #tpu.memory_space<vmem>>, vector<1x32xf32>
      %23 = vector.broadcast %22 : vector<1x32xf32> to vector<128x32xf32>
      %24 = arith.addf %21, %23 : vector<128x32xf32>
      %cst_23 = arith.constant 0.000000e+00 : f32
      %25 = vector.broadcast %cst_23 : f32 to vector<128x32xf32>
      %26 = arith.maximumf %24, %25 : vector<128x32xf32>
      %27 = arith.truncf %26 : vector<128x32xf32> to vector<128x32xbf16>
      %c0_24 = arith.constant 0 : index
      %c0_25 = arith.constant 0 : index
      %28 = vector.load %arg10[%c0_24, %c0_25] : memref<128x32xbf16, #tpu.memory_space<vmem>>, vector<128x32xbf16>
      tpu.vector_store %arg10[%c0_24, %c0_25], %27 {strides = array<i32>} : memref<128x32xbf16, #tpu.memory_space<vmem>>, vector<128x32xbf16>,
      %cst_26 = arith.constant 0.000000e+00 : f32
      %29 = vector.broadcast %cst_26 : f32 to vector<128x128xf32>
      %c0_27 = arith.constant 0 : index
      %c0_28 = arith.constant 0 : index
      %30 = vector.load %arg11[%c0_27, %c0_28] : memref<128x128xf32, #tpu.memory_space<vmem>>, vector<128x128xf32>
      tpu.vector_store %arg11[%c0_27, %c0_28], %29 {strides = array<i32>} : memref<128x128xf32, #tpu.memory_space<vmem>>, vector<128x128xf32>,
    } else {
    }
    %c0 = arith.constant 0 : index
    %c0_1 = arith.constant 0 : index
    %3 = vector.load %arg10[%c0, %c0_1] : memref<128x32xbf16, #tpu.memory_space<vmem>>, vector<128x32xbf16>
    %c0_2 = arith.constant 0 : index
    %c0_3 = arith.constant 0 : index
    %4 = vector.load %arg5[%c0_2, %c0_3] : memref<32x32xbf16, #tpu.memory_space<vmem>>, vector<32x32xbf16>
    %cst = arith.constant dense<0.000000e+00> : vector<128x32xf32>
    %5 = tpu.matmul %3, %4, %cst {dimension_numbers = #tpu.dot_dimension_numbers<[1], [0], [0], [1], [0, 0, 1, 1], [], []>} : vector<128x32xbf16>, vector<32x32xbf16>, vector<128x32xf32> -> vector<128x32xf32>
    %c0_4 = arith.constant 0 : index
    %c0_5 = arith.constant 0 : index
    %6 = vector.load %arg6[%c0_4, %c0_5] : memref<1x32xf32, #tpu.memory_space<vmem>>, vector<1x32xf32>
    %7 = vector.broadcast %6 : vector<1x32xf32> to vector<128x32xf32>
    %8 = arith.addf %5, %7 : vector<128x32xf32>
    %cst_6 = arith.constant 0.000000e+00 : f32
    %9 = vector.broadcast %cst_6 : f32 to vector<128x32xf32>
    %10 = arith.maximumf %8, %9 : vector<128x32xf32>
    %c0_7 = arith.constant 0 : index
    %c0_8 = arith.constant 0 : index
    %11 = vector.load %arg11[%c0_7, %c0_8] : memref<128x128xf32, #tpu.memory_space<vmem>>, vector<128x128xf32>
    %c0_9 = arith.constant 0 : index
    %c0_10 = arith.constant 0 : index
    %12 = vector.load %arg7[%c0_9, %c0_10] : memref<32x128xf32, #tpu.memory_space<vmem>>, vector<32x128xf32>
    %cst_11 = arith.constant dense<0.000000e+00> : vector<128x128xf32>
    %13 = tpu.matmul %10, %12, %cst_11 {dimension_numbers = #tpu.dot_dimension_numbers<[1], [0], [0], [1], [0, 0, 1, 1], [], []>} : vector<128x32xf32>, vector<32x128xf32>, vector<128x128xf32> -> vector<128x128xf32>
    %14 = arith.addf %11, %13 : vector<128x128xf32>
    %c0_12 = arith.constant 0 : index
    %c0_13 = arith.constant 0 : index
    %15 = vector.load %arg11[%c0_12, %c0_13] : memref<128x128xf32, #tpu.memory_space<vmem>>, vector<128x128xf32>
    tpu.vector_store %arg11[%c0_12, %c0_13], %14 {strides = array<i32>} : memref<128x128xf32, #tpu.memory_space<vmem>>, vector<128x128xf32>,
    %c0_i32_14 = arith.constant 0 : i32
    %16 = arith.cmpi eq, %arg1, %c0_i32_14 : i32
    %17 = arith.extui %16 : i1 to i32
    %c0_i32_15 = arith.constant 0 : i32
    %18 = arith.cmpi ne, %17, %c0_i32_15 : i32
    scf.if %18 {
      %c0_16 = arith.constant 0 : index
      %c0_17 = arith.constant 0 : index
      %19 = vector.load %arg11[%c0_16, %c0_17] : memref<128x128xf32, #tpu.memory_space<vmem>>, vector<128x128xf32>
      %c0_18 = arith.constant 0 : index
      %c0_19 = arith.constant 0 : index
      %20 = vector.load %arg8[%c0_18, %c0_19] : memref<1x128xf32, #tpu.memory_space<vmem>>, vector<1x128xf32>
      %21 = vector.broadcast %20 : vector<1x128xf32> to vector<128x128xf32>
      %22 = arith.addf %19, %21 : vector<128x128xf32>
      %23 = tpu.transpose %22, [1, 0] : vector<128x128xf32> -> vector<128x128xf32>
      %24 = vector.extract_strided_slice %23 {offsets = [0, 0], sizes = [1, 128], strides = [1, 1]} : vector<128x128xf32> to vector<1x128xf32>
      %c0_20 = arith.constant 0 : index
      %c0_21 = arith.constant 0 : index
      %25 = vector.load %arg9[%c0_20, %c0_21] : memref<1x128xf32, #tpu.memory_space<vmem>>, vector<1x128xf32>
      tpu.vector_store %arg9[%c0_20, %c0_21], %24 {strides = array<i32>} : memref<1x128xf32, #tpu.memory_space<vmem>>, vector<1x128xf32>,
    } else {
    }
    return
  }
  func.func @transform_0(%arg0: i32, %arg1: i32) -> (i32, i32) {
    %c0_i32 = arith.constant 0 : i32
    %c0_i32_0 = arith.constant 0 : i32
    return %arg0, %c0_i32 : i32, i32
  }
  func.func @transform_1(%arg0: i32, %arg1: i32) -> (i32, i32) {
    %c0_i32 = arith.constant 0 : i32
    %c0_i32_0 = arith.constant 0 : i32
    %c0_i32_1 = arith.constant 0 : i32
    return %c0_i32, %c0_i32_0 : i32, i32
  }
  func.func @transform_2(%arg0: i32, %arg1: i32) -> (i32, i32) {
    %c0_i32 = arith.constant 0 : i32
    %c0_i32_0 = arith.constant 0 : i32
    %c0_i32_1 = arith.constant 0 : i32
    return %c0_i32, %c0_i32_0 : i32, i32
  }
  func.func @transform_3(%arg0: i32, %arg1: i32) -> (i32, i32) {
    %c0_i32 = arith.constant 0 : i32
    %c0_i32_0 = arith.constant 0 : i32
    return %c0_i32, %arg1 : i32, i32
  }
  func.func @transform_4(%arg0: i32, %arg1: i32) -> (i32, i32) {
    %c0_i32 = arith.constant 0 : i32
    %c0_i32_0 = arith.constant 0 : i32
    return %c0_i32, %arg1 : i32, i32
  }
  func.func @transform_5(%arg0: i32, %arg1: i32) -> (i32, i32) {
    %c0_i32 = arith.constant 0 : i32
    %c0_i32_0 = arith.constant 0 : i32
    return %arg1, %c0_i32 : i32, i32
  }
  func.func @transform_6(%arg0: i32, %arg1: i32) -> (i32, i32) {
    %c0_i32 = arith.constant 0 : i32
    %c0_i32_0 = arith.constant 0 : i32
    %c0_i32_1 = arith.constant 0 : i32
    return %c0_i32, %c0_i32_0 : i32, i32
  }
  func.func @transform_7(%arg0: i32, %arg1: i32) -> (i32, i32) {
    %c0_i32 = arith.constant 0 : i32
    %c0_i32_0 = arith.constant 0 : i32
    return %c0_i32, %arg0 : i32, i32
  }
}

module attributes {stable_mosaic.version = 11 : i64} {
  func.func @mlp_kernel(%arg0: i32, %arg1: i32, %arg2: memref<128x32xbf16, #tpu.memory_space<vmem>>, %arg3: memref<32x32xbf16, #tpu.memory_space<vmem>>, %arg4: memref<1x32xf32, #tpu.memory_space<vmem>>, %arg5: memref<32x32xbf16, #tpu.memory_space<vmem>>, %arg6: memref<1x32xf32, #tpu.memory_space<vmem>>, %arg7: memref<32x128xf32, #tpu.memory_space<vmem>>, %arg8: memref<1x128xf32, #tpu.memory_space<vmem>>, %arg9: memref<1x128xf32, #tpu.memory_space<vmem>>, %arg10: memref<128x32xbf16, #tpu.memory_space<vmem>>, %arg11: memref<128x128xf32, #tpu.memory_space<vmem>>) attributes {dimension_semantics = [#tpu.dimension_semantics<parallel>, #tpu.dimension_semantics<arbitrary>], iteration_bounds = array<i64: 1, 1>, scalar_prefetch = 0 : i64, scratch_operands = 2 : i64, tpu.core_type = #tpu.core_type<tc>, window_params = [{transform_indices = @transform_0, window_bounds = array<i64: 128, 32>}, {pipeline_mode = #tpu.pipeline_mode<synchronous>, transform_indices = @transform_1, window_bounds = array<i64: 32, 32>}, {pipeline_mode = #tpu.pipeline_mode<synchronous>, transform_indices = @transform_2, window_bounds = array<i64: 1, 32>}, {transform_indices = @transform_3, window_bounds = array<i64: 32, 32>}, {transform_indices = @transform_4, window_bounds = array<i64: 1, 32>}, {transform_indices = @transform_5, window_bounds = array<i64: 32, 128>}, {pipeline_mode = #tpu.pipeline_mode<synchronous>, transform_indices = @transform_6, window_bounds = array<i64: 1, 128>}, {transform_indices = @transform_7, window_bounds = array<i64: 1, 128>}]} {
    %c0_i32 = arith.constant 0 : i32
    %0 = arith.cmpi eq, %arg1, %c0_i32 : i32
    %1 = arith.extui %0 : i1 to i32
    %c0_i32_0 = arith.constant 0 : i32
    %2 = arith.cmpi ne, %1, %c0_i32_0 : i32
    scf.if %2 {
      %c0_16 = arith.constant 0 : index
      %c0_17 = arith.constant 0 : index
      %19 = vector.load %arg2[%c0_16, %c0_17] : memref<128x32xbf16, #tpu.memory_space<vmem>>, vector<128x32xbf16>
      %c0_18 = arith.constant 0 : index
      %c0_19 = arith.constant 0 : index
      %20 = vector.load %arg3[%c0_18, %c0_19] : memref<32x32xbf16, #tpu.memory_space<vmem>>, vector<32x32xbf16>
      %cst_20 = arith.constant dense<0.000000e+00> : vector<128x32xf32>
      %21 = tpu.matmul %19, %20, %cst_20 {dimension_numbers = #tpu.dot_dimension_numbers<[1], [0], [0], [1], [0, 0, 1, 1], [], []>} : vector<128x32xbf16>, vector<32x32xbf16>, vector<128x32xf32> -> vector<128x32xf32>
      %c0_21 = arith.constant 0 : index
      %c0_22 = arith.constant 0 : index
      %22 = vector.load %arg4[%c0_21, %c0_22] : memref<1x32xf32, #tpu.memory_space<vmem>>, vector<1x32xf32>
      %23 = vector.broadcast %22 : vector<1x32xf32> to vector<128x32xf32>
      %24 = arith.addf %21, %23 : vector<128x32xf32>
      %cst_23 = arith.constant 0.000000e+00 : f32
      %25 = vector.broadcast %cst_23 : f32 to vector<128x32xf32>
      %26 = arith.maximumf %24, %25 : vector<128x32xf32>
      %27 = arith.truncf %26 : vector<128x32xf32> to vector<128x32xbf16>
      %c0_24 = arith.constant 0 : index
      %c0_25 = arith.constant 0 : index
      %28 = vector.load %arg10[%c0_24, %c0_25] : memref<128x32xbf16, #tpu.memory_space<vmem>>, vector<128x32xbf16>
      tpu.vector_store %arg10[%c0_24, %c0_25], %27 {strides = array<i32>} : memref<128x32xbf16, #tpu.memory_space<vmem>>, vector<128x32xbf16>,
      %cst_26 = arith.constant 0.000000e+00 : f32
      %29 = vector.broadcast %cst_26 : f32 to vector<128x128xf32>
      %c0_27 = arith.constant 0 : index
      %c0_28 = arith.constant 0 : index
      %30 = vector.load %arg11[%c0_27, %c0_28] : memref<128x128xf32, #tpu.memory_space<vmem>>, vector<128x128xf32>
      tpu.vector_store %arg11[%c0_27, %c0_28], %29 {strides = array<i32>} : memref<128x128xf32, #tpu.memory_space<vmem>>, vector<128x128xf32>,
    } else {
    }
    %c0 = arith.constant 0 : index
    %c0_1 = arith.constant 0 : index
    %3 = vector.load %arg10[%c0, %c0_1] : memref<128x32xbf16, #tpu.memory_space<vmem>>, vector<128x32xbf16>
    %c0_2 = arith.constant 0 : index
    %c0_3 = arith.constant 0 : index
    %4 = vector.load %arg5[%c0_2, %c0_3] : memref<32x32xbf16, #tpu.memory_space<vmem>>, vector<32x32xbf16>
    %cst = arith.constant dense<0.000000e+00> : vector<128x32xf32>
    %5 = tpu.matmul %3, %4, %cst {dimension_numbers = #tpu.dot_dimension_numbers<[1], [0], [0], [1], [0, 0, 1, 1], [], []>} : vector<128x32xbf16>, vector<32x32xbf16>, vector<128x32xf32> -> vector<128x32xf32>
    %c0_4 = arith.constant 0 : index
    %c0_5 = arith.constant 0 : index
    %6 = vector.load %arg6[%c0_4, %c0_5] : memref<1x32xf32, #tpu.memory_space<vmem>>, vector<1x32xf32>
    %7 = vector.broadcast %6 : vector<1x32xf32> to vector<128x32xf32>
    %8 = arith.addf %5, %7 : vector<128x32xf32>
    %cst_6 = arith.constant 0.000000e+00 : f32
    %9 = vector.broadcast %cst_6 : f32 to vector<128x32xf32>
    %10 = arith.maximumf %8, %9 : vector<128x32xf32>
    %c0_7 = arith.constant 0 : index
    %c0_8 = arith.constant 0 : index
    %11 = vector.load %arg11[%c0_7, %c0_8] : memref<128x128xf32, #tpu.memory_space<vmem>>, vector<128x128xf32>
    %c0_9 = arith.constant 0 : index
    %c0_10 = arith.constant 0 : index
    %12 = vector.load %arg7[%c0_9, %c0_10] : memref<32x128xf32, #tpu.memory_space<vmem>>, vector<32x128xf32>
    %cst_11 = arith.constant dense<0.000000e+00> : vector<128x128xf32>
    %13 = tpu.matmul %10, %12, %cst_11 {dimension_numbers = #tpu.dot_dimension_numbers<[1], [0], [0], [1], [0, 0, 1, 1], [], []>} : vector<128x32xf32>, vector<32x128xf32>, vector<128x128xf32> -> vector<128x128xf32>
    %14 = arith.addf %11, %13 : vector<128x128xf32>
    %c0_12 = arith.constant 0 : index
    %c0_13 = arith.constant 0 : index
    %15 = vector.load %arg11[%c0_12, %c0_13] : memref<128x128xf32, #tpu.memory_space<vmem>>, vector<128x128xf32>
    tpu.vector_store %arg11[%c0_12, %c0_13], %14 {strides = array<i32>} : memref<128x128xf32, #tpu.memory_space<vmem>>, vector<128x128xf32>,
    %c0_i32_14 = arith.constant 0 : i32
    %16 = arith.cmpi eq, %arg1, %c0_i32_14 : i32
    %17 = arith.extui %16 : i1 to i32
    %c0_i32_15 = arith.constant 0 : i32
    %18 = arith.cmpi ne, %17, %c0_i32_15 : i32
    scf.if %18 {
      %c0_16 = arith.constant 0 : index
      %c0_17 = arith.constant 0 : index
      %19 = vector.load %arg11[%c0_16, %c0_17] : memref<128x128xf32, #tpu.memory_space<vmem>>, vector<128x128xf32>
      %c0_18 = arith.constant 0 : index
      %c0_19 = arith.constant 0 : index
      %20 = vector.load %arg8[%c0_18, %c0_19] : memref<1x128xf32, #tpu.memory_space<vmem>>, vector<1x128xf32>
      %21 = vector.broadcast %20 : vector<1x128xf32> to vector<128x128xf32>
      %22 = arith.addf %19, %21 : vector<128x128xf32>
      %23 = tpu.transpose %22, [1, 0] : vector<128x128xf32> -> vector<128x128xf32>
      %24 = vector.extract_strided_slice %23 {offsets = [0, 0], sizes = [1, 128], strides = [1, 1]} : vector<128x128xf32> to vector<1x128xf32>
      %c0_20 = arith.constant 0 : index
      %c0_21 = arith.constant 0 : index
      %25 = vector.load %arg9[%c0_20, %c0_21] : memref<1x128xf32, #tpu.memory_space<vmem>>, vector<1x128xf32>
      tpu.vector_store %arg9[%c0_20, %c0_21], %24 {strides = array<i32>} : memref<1x128xf32, #tpu.memory_space<vmem>>, vector<1x128xf32>,
    } else {
    }
    return
  }
  func.func @transform_0(%arg0: i32, %arg1: i32) -> (i32, i32) {
    %c0_i32 = arith.constant 0 : i32
    %c0_i32_0 = arith.constant 0 : i32
    return %arg0, %c0_i32 : i32, i32
  }
  func.func @transform_1(%arg0: i32, %arg1: i32) -> (i32, i32) {
    %c0_i32 = arith.constant 0 : i32
    %c0_i32_0 = arith.constant 0 : i32
    %c0_i32_1 = arith.constant 0 : i32
    return %c0_i32, %c0_i32_0 : i32, i32
  }
  func.func @transform_2(%arg0: i32, %arg1: i32) -> (i32, i32) {
    %c0_i32 = arith.constant 0 : i32
    %c0_i32_0 = arith.constant 0 : i32
    %c0_i32_1 = arith.constant 0 : i32
    return %c0_i32, %c0_i32_0 : i32, i32
  }
  func.func @transform_3(%arg0: i32, %arg1: i32) -> (i32, i32) {
    %c0_i32 = arith.constant 0 : i32
    %c0_i32_0 = arith.constant 0 : i32
    return %c0_i32, %arg1 : i32, i32
  }
  func.func @transform_4(%arg0: i32, %arg1: i32) -> (i32, i32) {
    %c0_i32 = arith.constant 0 : i32
    %c0_i32_0 = arith.constant 0 : i32
    return %c0_i32, %arg1 : i32, i32
  }
  func.func @transform_5(%arg0: i32, %arg1: i32) -> (i32, i32) {
    %c0_i32 = arith.constant 0 : i32
    %c0_i32_0 = arith.constant 0 : i32
    return %arg1, %c0_i32 : i32, i32
  }
  func.func @transform_6(%arg0: i32, %arg1: i32) -> (i32, i32) {
    %c0_i32 = arith.constant 0 : i32
    %c0_i32_0 = arith.constant 0 : i32
    %c0_i32_1 = arith.constant 0 : i32
    return %c0_i32, %c0_i32_0 : i32, i32
  }
  func.func @transform_7(%arg0: i32, %arg1: i32) -> (i32, i32) {
    %c0_i32 = arith.constant 0 : i32
    %c0_i32_0 = arith.constant 0 : i32
    return %c0_i32, %arg0 : i32, i32
  }
}

</mosaic_0001>

<bundles_post_ra>
// kernel: tpu_custom_call.1
= control target key start
LH: loop header
LB: loop body
LE: loop exit
PB: predicated region body
PF: predicated region fallthrough
CT: control target
= control target key end

     0   :  { %vm111_vm0 = vcmask 261120   ;;  %s1142_s0 = inlined_call_operand.vmem [shape: bf16[128,32], index: 0, kind: input, shape index: {}]   ;;  %s1143_s1 = inlined_call_operand.vmem [shape: bf16[32,32], index: 1, kind: input, shape index: {}]   ;;  %s1144_s2 = inlined_call_operand.vmem [shape: f32[1,32], index: 2, kind: input, shape index: {}]   ;;  %s1145_s3 = inlined_call_operand.vmem [shape: bf16[32,32], index: 3, kind: input, shape index: {}]   ;;  %s1146_s4 = inlined_call_operand.vmem [shape: f32[1,32], index: 4, kind: input, shape index: {}]   ;;  %s1147_s5 = inlined_call_operand.vmem [shape: f32[32,128], index: 5, kind: input, shape index: {}]   ;;  %s1148_s6 = inlined_call_operand.vmem [shape: f32[1,128], index: 6, kind: input, shape index: {}]   ;;  %s1149_s7 = inlined_call_operand.hbm [shape: f32[1,128], index: 7, kind: output, shape index: {}]  }
   0x1   :  { %v956_v0 = vld [vmem:[%s1143_s1] sm:$0xff]   ;;  %v957_v1 = vld [vmem:[%s1143_s1 + $0x8] sm:$0xff]   ;;  %v960_v4 = vld [vmem:[%s1142_s0 + $0x10] sm:$0xff]  }
   0x2   :  { %871 = vmatprep.subr.bf16.mxu0 %v956_v0  ;;  %v958_v2 = vld [vmem:[%s1142_s0] sm:$0xff]   ;;  %951 = vmatprep.subr.bf16.mxu1 %v956_v0  ;;  %v959_v3 = vld [vmem:[%s1142_s0 + $0x8] sm:$0xff]   ;;  %v964_v7 = vld [vmem:[%s1142_s0 + $0x30] sm:$0xff]  }
   0x3   :  { %872 = vmatpush3.bf16.msra.mxu0 %v956_v0  ;;  %953 = vmatpush3.bf16.msra.mxu1 %v956_v0  ;;  %v962_v5 = vld [vmem:[%s1142_s0 + $0x20] sm:$0xff]   ;;  %v963_v6 = vld [vmem:[%s1142_s0 + $0x28] sm:$0xff]  }
   0x4   :  { %873 = vmatprep.subr.bf16.mxu0 %v957_v1  ;;  %875 = vmatprep.mubr.msk.bf16.mxu0 %vm111_vm0, %v958_v2 }
   0x5   :  { %952 = vmatprep.subr.bf16.mxu1 %v957_v1  ;;  %883 = vmatprep.mubr.msk.bf16.mxu1 %vm111_vm0, %v962_v5 }
   0x7   :  { %874 = vmatpush3.bf16.msra.mxu0 %v957_v1  ;;  %954 = vmatpush3.bf16.msra.mxu1 %v957_v1 }
   0xa   :  { %876 = vmatmul.mubr.msk.bf16.vlgmr.msra.gmra.mrb[0].mxu0 %vm111_vm0, %v959_v3  ;;  %884 = vmatmul.mubr.msk.bf16.vlgmr.msra.gmra.mrb[0].mxu1 %vm111_vm0, %v963_v6 }
   0xb   :  { %879 = vmatprep.mubr.msk.bf16.mxu0 %vm111_vm0, %v960_v4  ;;  %887 = vmatprep.mubr.msk.bf16.mxu1 %vm111_vm0, %v964_v7 }
   0xc   :  { %12 = vsyncpa [#allocation5], 0  ;;  %v961_v8 = vld [vmem:[%s1142_s0 + $0x18] sm:$0xff]   ;;  %v966_v10 = vld [vmem:[%s1145_s3] sm:$0xff]  }
   0xd   :  { %v965_v9 = vld [vmem:[%s1142_s0 + $0x38] sm:$0xff]   ;;  %891 = vmatprep.subr.bf16.mxu1 %v966_v10  ;;  %v967_v11 = vld [vmem:[%s1145_s3 + $0x8] sm:$0xff]   ;;  %v466_v12 = vld [vmem:[%s1147_s5] sm:$0xff] }
   0xe   :  { %892 = vmatpush3.bf16.msra.mxu1 %v966_v10  ;;  %v467_v13 = vld [vmem:[%s1147_s5 + $0x8] sm:$0xff]  ;;  %v468_v14 = vld [vmem:[%s1147_s5 + $0x10] sm:$0xff]  ;;  %v469_v16 = vld [vmem:[%s1147_s5 + $0x18] sm:$0xff] }
   0xf   :  { %893 = vmatprep.subr.bf16.mxu1 %v967_v11  ;;  %v943_v15 = vpack.c.bf16 %v467_v13, %v466_v12  ;;  %v947_v17 = vpack.c.bf16 %v469_v16, %v468_v14  ;;  %v784_v18 = vld [vmem:[%s1144_s2] ss:$0 sm:$0xff] }
  0x11   :  { %944 = vmatprep.subr.bf16.mxu0 %v943_v15 }
  0x12   :  { %880 = vmatmul.mubr.msk.bf16.gmra.mrb[4].mxu0 %vm111_vm0, %v961_v8  ;;  %888 = vmatmul.mubr.msk.bf16.gmra.mrb[4].mxu1 %vm111_vm0, %v965_v9 }
  0x13   :  { %894 = vmatpush3.bf16.msra.mxu1 %v967_v11  ;;  %946 = vmatpush3.bf16.msra.mxu0 %v943_v15 }
  0x14   :  { %948 = vmatprep.subr.bf16.mxu0 %v947_v17 }
  0x17   :  { %950 = vmatpush3.bf16.msra.mxu0 %v947_v17 }
  0xdd   :  { %v877_v19 = vpop.f32.mrb[0].mxu0  ;;  %v885_v20 = vpop.f32.mrb[0].mxu1 }
  0xde   :  { %v179_v21 = vadd.f32 %v877_v19, %v784_v18  ;;  %v170_v22 = vpop.f32.mrb[1].mxu0  ;;  %v211_v23 = vadd.f32 %v885_v20, %v784_v18  ;;  %v202_v24 = vpop.f32.mrb[1].mxu1  ;;  %v803_v19 = vld [vmem:[%s1146_s4] ss:$0 sm:$0xff] }
  0xdf   :  { %v171_v25 = vadd.f32 %v784_v18, %v170_v22  ;;  %v878_v26 = vpop.f32.mrb[2].mxu0  ;;  %v203_v27 = vadd.f32 %v784_v18, %v202_v24  ;;  %v886_v28 = vpop.f32.mrb[2].mxu1 }
  0xe0   :  { %v182_v29 = vadd.f32 %v878_v26, %v784_v18  ;;  %v173_v30 = vpop.f32.mrb[3].mxu0  ;;  %v243_v31 = vmax.f32 %v211_v23, 0.0  ;;  %v214_v32 = vadd.f32 %v886_v28, %v784_v18  ;;  %v205_v33 = vpop.f32.mrb[3].mxu1  ;;  %v235_v37 = vmax.f32 %v179_v21, 0.0 }
  0xe1   :  { %v174_v34 = vadd.f32 %v784_v18, %v173_v30  ;;  %v241_v35 = vmax.f32 %v203_v27, 0.0  ;;  %v206_v36 = vadd.f32 %v784_v18, %v205_v33  ;;  %v233_v40 = vmax.f32 %v171_v25, 0.0 }
  0xe2   :  { %v236_v38 = vmax.f32 %v182_v29, 0.0  ;;  %v244_v39 = vmax.f32 %v214_v32, 0.0 }
  0xe3   :  { %v234_v41 = vmax.f32 %v174_v34, 0.0  ;;  %v242_v42 = vmax.f32 %v206_v36, 0.0 }
  0xe4   :  { %v250_v43 = vpack.c.bf16 %v236_v38, %v235_v37  ;;  %v254_v44 = vpack.c.bf16 %v244_v39, %v243_v31 }
  0xe5   :  { %v249_v45 = vpack.c.bf16 %v234_v41, %v233_v40  ;;  %v881_v46 = vpop.f32.mrb[4].mxu0  ;;  %v253_v47 = vpack.c.bf16 %v242_v42, %v241_v35  ;;  %v889_v48 = vpop.f32.mrb[4].mxu1 }
  0xe6   :  { %258 = vst.msk [vmem:[#allocation2 + $0x8] sm:$0xff] %vm111_vm0, %v250_v43  ;;  %v195_v49 = vadd.f32 %v881_v46, %v784_v18  ;;  %v186_v50 = vpop.f32.mrb[5].mxu0  ;;  %262 = vst.msk [vmem:[#allocation2 + $0x28] sm:$0xff] %vm111_vm0, %v254_v44  ;;  %v227_v51 = vadd.f32 %v889_v48, %v784_v18  ;;  %v218_v52 = vpop.f32.mrb[5].mxu1 }
  0xe7   :  { %257 = vst.msk [vmem:[#allocation2] sm:$0xff] %vm111_vm0, %v249_v45  ;;  %v187_v53 = vadd.f32 %v784_v18, %v186_v50  ;;  %v882_v54 = vpop.f32.mrb[6].mxu0  ;;  %261 = vst.msk [vmem:[#allocation2 + $0x20] sm:$0xff] %vm111_vm0, %v253_v47  ;;  %v219_v55 = vadd.f32 %v784_v18, %v218_v52  ;;  %v890_v56 = vpop.f32.mrb[6].mxu1 }
  0xe8   :  { %v239_v57 = vmax.f32 %v195_v49, 0.0  ;;  %v198_v58 = vadd.f32 %v882_v54, %v784_v18  ;;  %v189_v59 = vpop.f32.mrb[7].mxu0  ;;  %v247_v60 = vmax.f32 %v227_v51, 0.0  ;;  %v230_v61 = vadd.f32 %v890_v56, %v784_v18  ;;  %v221_v62 = vpop.f32.mrb[7].mxu1 }
  0xe9   :  { %v237_v63 = vmax.f32 %v187_v53, 0.0  ;;  %v190_v0 = vadd.f32 %v784_v18, %v189_v59  ;;  %v245_v1 = vmax.f32 %v219_v55, 0.0  ;;  %v222_v2 = vadd.f32 %v784_v18, %v221_v62 }
  0xea   :  { %v240_v3 = vmax.f32 %v198_v58, 0.0  ;;  %v248_v4 = vmax.f32 %v230_v61, 0.0 }
  0xeb   :  { %v238_v5 = vmax.f32 %v190_v0, 0.0  ;;  %v246_v6 = vmax.f32 %v222_v2, 0.0 }
  0xec   :  { %v252_v7 = vpack.c.bf16 %v240_v3, %v239_v57  ;;  %v256_v8 = vpack.c.bf16 %v248_v4, %v247_v60  ;;  %v830_v4 = vld [vmem:[%s1148_s6] ss:$0 sm:$0xff]  ;;  %s992_s6 = smov [#allocation4]  }
  0xed   :  { %v251_v9 = vpack.c.bf16 %v238_v5, %v237_v63  ;;  %v255_v10 = vpack.c.bf16 %v246_v6, %v245_v1  ;;  %v282_v12 = vld [vmem:[#allocation2 + $0x8] sm:$0xff]  ;;  %s776_s10 = sshll.u32 %s992_s6, 4  ;;  %s777_s10 = int_to_ptr.vmem [resolvable:$true] %s776_s10 }
  0xee   :  { %260 = vst.msk [vmem:[#allocation2 + $0x18] sm:$0xff] %vm111_vm0, %v252_v7  ;;  %v281_v11 = vld [vmem:[#allocation2] sm:$0xff]  ;;  %264 = vst.msk [vmem:[#allocation2 + $0x38] sm:$0xff] %vm111_vm0, %v256_v8  ;;  %v286_v16 = vld [vmem:[#allocation2 + $0x28] sm:$0xff]  ;;  %s968_s1 = scalar_lea.vmem %s777_s10, 16  ;;  %s972_s11 = scalar_lea.vmem %s777_s10, 32 }
  0xef   :  { %259 = vst.msk [vmem:[#allocation2 + $0x10] sm:$0xff] %vm111_vm0, %v251_v9  ;;  %895 = vmatprep.mubr.msk.bf16.mxu1 %vm111_vm0, %v281_v11  ;;  %263 = vst.msk [vmem:[#allocation2 + $0x30] sm:$0xff] %vm111_vm0, %v255_v10  ;;  %v285_v15 = vld [vmem:[#allocation2 + $0x20] sm:$0xff]  ;;  %p969_p0 = scmp.ne.s32.totalorder %s777_s10, %s968_s1  ;;  %p973_p1 = scmp.lt.s32.totalorder %s777_s10, %s777_s10 }
  0xf0   :  { %896 = vmatmul.mubr.msk.bf16.vlgmr.msra.gmra.mrb[8].mxu1 %vm111_vm0, %v282_v12  ;;  %p974_p2 = scmp.lt.s32.totalorder %s972_s11, %s968_s1 }
  0xf2   :  { %p975_p3 = por %p974_p2, %p973_p1 }
  0xf4   :  { %p976_p4 = pnand %p975_p3, %p969_p0 }
  0xf5   :  { %v284_v13 = vld [vmem:[#allocation2 + $0x18] sm:$0xff] }
  0xf6   :  { %v283_v14 = vld [vmem:[#allocation2 + $0x10] sm:$0xff]  ;;  %v288_v18 = vld [vmem:[#allocation2 + $0x38] sm:$0xff] }
  0xf7   :  { %899 = vmatprep.mubr.msk.bf16.mxu1 %vm111_vm0, %v283_v14  ;;  %v287_v17 = vld [vmem:[#allocation2 + $0x30] sm:$0xff] }
  0xf8   :  { %900 = vmatmul.mubr.msk.bf16.gmra.mrb[12].mxu1 %vm111_vm0, %v284_v13 }
  0xf9   :  { %903 = vmatprep.mubr.msk.bf16.mxu1 %vm111_vm0, %v285_v15 }
 0x100   :  { %904 = vmatmul.mubr.msk.bf16.gmra.mrb[16].mxu1 %vm111_vm0, %v286_v16 }
 0x101   :  { %907 = vmatprep.mubr.msk.bf16.mxu1 %vm111_vm0, %v287_v17 }
 0x108   :  { %908 = vmatmul.mubr.msk.bf16.gmra.mrb[20].mxu1 %vm111_vm0, %v288_v18 }
 0x1c3   :  { %v897_v20 = vpop.f32.mrb[8].mxu1 }
 0x1c4   :  { %v371_v21 = vpop.f32.mrb[9].mxu1  ;;  %v380_v24 = vadd.f32 %v897_v20, %v803_v19 }
 0x1c5   :  { %v372_v22 = vadd.f32 %v803_v19, %v371_v21  ;;  %v898_v23 = vpop.f32.mrb[10].mxu1 }
 0x1c6   :  { %v374_v25 = vpop.f32.mrb[11].mxu1  ;;  %v383_v28 = vadd.f32 %v898_v23, %v803_v19  ;;  %v436_v30 = vmax.f32 %v380_v24, 0.0 }
 0x1c7   :  { %v434_v26 = vmax.f32 %v372_v22, 0.0  ;;  %v375_v27 = vadd.f32 %v803_v19, %v374_v25 }
 0x1c8   :  { %v437_v34 = vmax.f32 %v383_v28, 0.0 }
 0x1c9   :  { %v435_v29 = vmax.f32 %v375_v27, 0.0  ;;  %919 = vmatprep.mubr.msk.f32.mxu0 %vm111_vm0, %v434_v26 }
 0x1cb   :  { %v901_v31 = vpop.f32.mrb[12].mxu1  ;;  %920 = vmatmul.mubr.msk.f32.vlgmr.msra.gmra.mrb[8].mxu0 %vm111_vm0, %v435_v29 }
 0x1cc   :  { %v396_v32 = vadd.f32 %v901_v31, %v803_v19  ;;  %v387_v33 = vpop.f32.mrb[13].mxu1  ;;  %922 = vmatprep.mubr.msk.f32.mxu0 %vm111_vm0, %v436_v30 }
 0x1cd   :  { %v388_v35 = vadd.f32 %v803_v19, %v387_v33  ;;  %v902_v36 = vpop.f32.mrb[14].mxu1 }
 0x1ce   :  { %v390_v37 = vpop.f32.mrb[15].mxu1  ;;  %v440_v40 = vmax.f32 %v396_v32, 0.0  ;;  %v399_v41 = vadd.f32 %v902_v36, %v803_v19 }
 0x1cf   :  { %v438_v38 = vmax.f32 %v388_v35, 0.0  ;;  %v391_v39 = vadd.f32 %v803_v19, %v390_v37  ;;  %923 = vmatmul.mubr.msk.f32.gmra.mrb[10].mxu0 %vm111_vm0, %v437_v34 }
 0x1d0   :  { %v441_v46 = vmax.f32 %v399_v41, 0.0 }
 0x1d1   :  { %v439_v42 = vmax.f32 %v391_v39, 0.0  ;;  %925 = vmatprep.mubr.msk.f32.mxu0 %vm111_vm0, %v438_v38 }
 0x1d3   :  { %926 = vmatmul.mubr.msk.f32.gmra.mrb[12].mxu0 %vm111_vm0, %v439_v42  ;;  %v905_v43 = vpop.f32.mrb[16].mxu1 }
 0x1d4   :  { %928 = vmatprep.mubr.msk.f32.mxu0 %vm111_vm0, %v440_v40  ;;  %v412_v44 = vadd.f32 %v905_v43, %v803_v19  ;;  %v403_v45 = vpop.f32.mrb[17].mxu1 }
 0x1d5   :  { %v404_v47 = vadd.f32 %v803_v19, %v403_v45  ;;  %v906_v48 = vpop.f32.mrb[18].mxu1 }
 0x1d6   :  { %v406_v49 = vpop.f32.mrb[19].mxu1  ;;  %v415_v51 = vadd.f32 %v906_v48, %v803_v19  ;;  %v444_v53 = vmax.f32 %v412_v44, 0.0 }
 0x1d7   :  { %929 = vmatmul.mubr.msk.f32.gmra.mrb[14].mxu0 %vm111_vm0, %v441_v46  ;;  %v442_v50 = vmax.f32 %v404_v47, 0.0  ;;  %v407_v52 = vadd.f32 %v803_v19, %v406_v49 }
 0x1d8   :  { %v445_v55 = vmax.f32 %v415_v51, 0.0 }
 0x1d9   :  { %v443_v54 = vmax.f32 %v407_v52, 0.0  ;;  %931 = vmatprep.mubr.msk.f32.mxu0 %vm111_vm0, %v442_v50 }
 0x1db   :  { %932 = vmatmul.mubr.msk.f32.gmra.mrb[16].mxu0 %vm111_vm0, %v443_v54  ;;  %v909_v56 = vpop.f32.mrb[20].mxu1 }
 0x1dc   :  { %934 = vmatprep.mubr.msk.f32.mxu0 %vm111_vm0, %v444_v53  ;;  %v428_v57 = vadd.f32 %v909_v56, %v803_v19  ;;  %v419_v58 = vpop.f32.mrb[21].mxu1 }
 0x1dd   :  { %v420_v59 = vadd.f32 %v803_v19, %v419_v58  ;;  %v910_v60 = vpop.f32.mrb[22].mxu1 }
 0x1de   :  { %v422_v61 = vpop.f32.mrb[23].mxu1  ;;  %v431_v63 = vadd.f32 %v910_v60, %v803_v19  ;;  %v448_v1 = vmax.f32 %v428_v57, 0.0 }
 0x1df   :  { %935 = vmatmul.mubr.msk.f32.gmra.mrb[18].mxu0 %vm111_vm0, %v445_v55  ;;  %v446_v62 = vmax.f32 %v420_v59, 0.0  ;;  %v423_v0 = vadd.f32 %v803_v19, %v422_v61 }
 0x1e0   :  { %v449_v3 = vmax.f32 %v431_v63, 0.0 }
 0x1e1   :  { %v447_v2 = vmax.f32 %v423_v0, 0.0  ;;  %937 = vmatprep.mubr.msk.f32.mxu0 %vm111_vm0, %v446_v62 }
 0x1e3   :  { %938 = vmatmul.mubr.msk.f32.gmra.mrb[20].mxu0 %vm111_vm0, %v447_v2 }
 0x1e4   :  { %940 = vmatprep.mubr.msk.f32.mxu0 %vm111_vm0, %v448_v1 }
 0x1e7   :  { %941 = vmatmul.mubr.msk.f32.gmra.mrb[22].mxu0 %vm111_vm0, %v449_v3 }
 0x29e   :  { %v921_v5 = vpop.f32.mrb[8].mxu0 }
 0x29f   :  { %v584_v6 = vpop.f32.mrb[9].mxu0  ;;  %v722_v10 = vadd.f32 %v921_v5, %v830_v4 }
 0x2a0   :  { %v721_v7 = vadd.f32 %v830_v4, %v584_v6 }
 0x2a2   :  { %v924_v8 = vpop.f32.mrb[10].mxu0  ;;  %737 = vxpose.xlu0.b32.start [1/16] (narrow) %v721_v7, 8 }
 0x2a3   :  { %v594_v9 = vpop.f32.mrb[11].mxu0  ;;  %v724_v16 = vadd.f32 %v924_v8, %v830_v4 }
 0x2a4   :  { %v723_v13 = vadd.f32 %v830_v4, %v594_v9 }
 0x2a6   :  { %v927_v11 = vpop.f32.mrb[12].mxu0  ;;  %738 = vxpose.xlu0.b32.cont [2/16] (narrow) %v722_v10, 8 }
 0x2a7   :  { %v604_v12 = vpop.f32.mrb[13].mxu0  ;;  %v726_v22 = vadd.f32 %v927_v11, %v830_v4 }
 0x2a8   :  { %v725_v19 = vadd.f32 %v830_v4, %v604_v12 }
 0x2aa   :  { %v930_v14 = vpop.f32.mrb[14].mxu0  ;;  %739 = vxpose.xlu0.b32.cont [3/16] (narrow) %v723_v13, 8 }
 0x2ab   :  { %v614_v15 = vpop.f32.mrb[15].mxu0  ;;  %v728_v28 = vadd.f32 %v930_v14, %v830_v4 }
 0x2ac   :  { %v727_v25 = vadd.f32 %v830_v4, %v614_v15 }
 0x2ae   :  { %740 = vxpose.xlu0.b32.cont [4/16] (narrow) %v724_v16, 8  ;;  %v933_v17 = vpop.f32.mrb[16].mxu0 }
 0x2af   :  { %v624_v18 = vpop.f32.mrb[17].mxu0  ;;  %v730_v30 = vadd.f32 %v933_v17, %v830_v4 }
 0x2b0   :  { %v729_v29 = vadd.f32 %v830_v4, %v624_v18 }
 0x2b2   :  { %741 = vxpose.xlu0.b32.cont [5/16] (narrow) %v725_v19, 8  ;;  %v936_v20 = vpop.f32.mrb[18].mxu0 }
 0x2b3   :  { %v634_v21 = vpop.f32.mrb[19].mxu0  ;;  %v732_v32 = vadd.f32 %v936_v20, %v830_v4 }
 0x2b4   :  { %v731_v31 = vadd.f32 %v830_v4, %v634_v21 }
 0x2b6   :  { %742 = vxpose.xlu0.b32.cont [6/16] (narrow) %v726_v22, 8  ;;  %v939_v23 = vpop.f32.mrb[20].mxu0 }
 0x2b7   :  { %v644_v24 = vpop.f32.mrb[21].mxu0  ;;  %v734_v34 = vadd.f32 %v939_v23, %v830_v4 }
 0x2b8   :  { %v733_v33 = vadd.f32 %v830_v4, %v644_v24 }
 0x2ba   :  { %743 = vxpose.xlu0.b32.cont [7/16] (narrow) %v727_v25, 8  ;;  %v942_v26 = vpop.f32.mrb[22].mxu0 }
 0x2bb   :  { %v654_v27 = vpop.f32.mrb[23].mxu0  ;;  %v736_v36 = vadd.f32 %v942_v26, %v830_v4 }
 0x2bc   :  { %v735_v35 = vadd.f32 %v830_v4, %v654_v27 }
 0x2be   :  { %744 = vxpose.xlu0.b32.cont [8/16] (narrow) %v728_v28, 8 }
 0x2c2   :  { %745 = vxpose.xlu0.b32.cont [9/16] (narrow) %v729_v29, 8 }
 0x2c6   :  { %746 = vxpose.xlu0.b32.cont [10/16] (narrow) %v730_v30, 8 }
 0x2ca   :  { %747 = vxpose.xlu0.b32.cont [11/16] (narrow) %v731_v31, 8 }
 0x2ce   :  { %748 = vxpose.xlu0.b32.cont [12/16] (narrow) %v732_v32, 8 }
 0x2d2   :  { %749 = vxpose.xlu0.b32.cont [13/16] (narrow) %v733_v33, 8 }
 0x2d6   :  { %750 = vxpose.xlu0.b32.cont [14/16] (narrow) %v734_v34, 8 }
 0x2da   :  { %751 = vxpose.xlu0.b32.cont [15/16] (narrow) %v735_v35, 8 }
 0x2de   :  { %752 = vxpose.xlu0.b32.end [16/16] (narrow) %v736_v36, 8 }
 0x322   :  { %v753_v37 = vpop.trf.xlu0 }
 0x323   :  { %769 = vst [vmem:[#allocation4] sm:$0x1] %v753_v37 }
 0x324   :  { %979 = shalt.err (!%p976_p4)
}
 0x325   :  { %s980_s14 = scalar_lea.hbm %s1149_s7, 16 }
 0x326   :  { %p981_p5 = scmp.ne.s32.totalorder %s1149_s7, %s980_s14  ;;  %p984_p6 = scmp.lt.u32.totalorder %s980_s14, %s1149_s7 }
 0x328   :  { %p986_p7 = pnand %p984_p6, %p981_p5 }
 0x32a   :  { %989 = shalt.err (!%p986_p7)
}
 0x32b   :  { %779 = dma.vmem_to_hbm [thread:$0]  %s777_s10, 16, %s1149_s7, [#allocation5]  }
 0x32c   :  { %990 = dma.done.wait [#allocation5], 16  }
 0x32d   :  { %991 = vsyncadd [#allocation5], 4294967280 }
 0x32e   :  { %783 = vsyncpa [#allocation5], 1 }

// kernel: tpu_custom_call.1
= control target key start
LH: loop header
LB: loop body
LE: loop exit
PB: predicated region body
PF: predicated region fallthrough
CT: control target
= control target key end

     0   :  { %vm111_vm0 = vcmask 261120   ;;  %s1142_s0 = inlined_call_operand.vmem [shape: bf16[128,32], index: 0, kind: input, shape index: {}]   ;;  %s1143_s1 = inlined_call_operand.vmem [shape: bf16[32,32], index: 1, kind: input, shape index: {}]   ;;  %s1144_s2 = inlined_call_operand.vmem [shape: f32[1,32], index: 2, kind: input, shape index: {}]   ;;  %s1145_s3 = inlined_call_operand.vmem [shape: bf16[32,32], index: 3, kind: input, shape index: {}]   ;;  %s1146_s4 = inlined_call_operand.vmem [shape: f32[1,32], index: 4, kind: input, shape index: {}]   ;;  %s1147_s5 = inlined_call_operand.vmem [shape: f32[32,128], index: 5, kind: input, shape index: {}]   ;;  %s1148_s6 = inlined_call_operand.vmem [shape: f32[1,128], index: 6, kind: input, shape index: {}]   ;;  %s1149_s7 = inlined_call_operand.hbm [shape: f32[1,128], index: 7, kind: output, shape index: {}]  }
   0x1   :  { %v956_v0 = vld [vmem:[%s1143_s1] sm:$0xff]   ;;  %v957_v1 = vld [vmem:[%s1143_s1 + $0x8] sm:$0xff]   ;;  %v960_v4 = vld [vmem:[%s1142_s0 + $0x10] sm:$0xff]  }
   0x2   :  { %871 = vmatprep.subr.bf16.mxu0 %v956_v0  ;;  %v958_v2 = vld [vmem:[%s1142_s0] sm:$0xff]   ;;  %951 = vmatprep.subr.bf16.mxu1 %v956_v0  ;;  %v959_v3 = vld [vmem:[%s1142_s0 + $0x8] sm:$0xff]   ;;  %v964_v7 = vld [vmem:[%s1142_s0 + $0x30] sm:$0xff]  }
   0x3   :  { %872 = vmatpush3.bf16.msra.mxu0 %v956_v0  ;;  %953 = vmatpush3.bf16.msra.mxu1 %v956_v0  ;;  %v962_v5 = vld [vmem:[%s1142_s0 + $0x20] sm:$0xff]   ;;  %v963_v6 = vld [vmem:[%s1142_s0 + $0x28] sm:$0xff]  }
   0x4   :  { %873 = vmatprep.subr.bf16.mxu0 %v957_v1  ;;  %875 = vmatprep.mubr.msk.bf16.mxu0 %vm111_vm0, %v958_v2 }
   0x5   :  { %952 = vmatprep.subr.bf16.mxu1 %v957_v1  ;;  %883 = vmatprep.mubr.msk.bf16.mxu1 %vm111_vm0, %v962_v5 }
   0x7   :  { %874 = vmatpush3.bf16.msra.mxu0 %v957_v1  ;;  %954 = vmatpush3.bf16.msra.mxu1 %v957_v1 }
   0xa   :  { %876 = vmatmul.mubr.msk.bf16.vlgmr.msra.gmra.mrb[0].mxu0 %vm111_vm0, %v959_v3  ;;  %884 = vmatmul.mubr.msk.bf16.vlgmr.msra.gmra.mrb[0].mxu1 %vm111_vm0, %v963_v6 }
   0xb   :  { %879 = vmatprep.mubr.msk.bf16.mxu0 %vm111_vm0, %v960_v4  ;;  %887 = vmatprep.mubr.msk.bf16.mxu1 %vm111_vm0, %v964_v7 }
   0xc   :  { %12 = vsyncpa [#allocation5], 0  ;;  %v961_v8 = vld [vmem:[%s1142_s0 + $0x18] sm:$0xff]   ;;  %v966_v10 = vld [vmem:[%s1145_s3] sm:$0xff]  }
   0xd   :  { %v965_v9 = vld [vmem:[%s1142_s0 + $0x38] sm:$0xff]   ;;  %891 = vmatprep.subr.bf16.mxu1 %v966_v10  ;;  %v967_v11 = vld [vmem:[%s1145_s3 + $0x8] sm:$0xff]   ;;  %v466_v12 = vld [vmem:[%s1147_s5] sm:$0xff] }
   0xe   :  { %892 = vmatpush3.bf16.msra.mxu1 %v966_v10  ;;  %v467_v13 = vld [vmem:[%s1147_s5 + $0x8] sm:$0xff]  ;;  %v468_v14 = vld [vmem:[%s1147_s5 + $0x10] sm:$0xff]  ;;  %v469_v16 = vld [vmem:[%s1147_s5 + $0x18] sm:$0xff] }
   0xf   :  { %893 = vmatprep.subr.bf16.mxu1 %v967_v11  ;;  %v943_v15 = vpack.c.bf16 %v467_v13, %v466_v12  ;;  %v947_v17 = vpack.c.bf16 %v469_v16, %v468_v14  ;;  %v784_v18 = vld [vmem:[%s1144_s2] ss:$0 sm:$0xff] }
  0x11   :  { %944 = vmatprep.subr.bf16.mxu0 %v943_v15 }
  0x12   :  { %880 = vmatmul.mubr.msk.bf16.gmra.mrb[4].mxu0 %vm111_vm0, %v961_v8  ;;  %888 = vmatmul.mubr.msk.bf16.gmra.mrb[4].mxu1 %vm111_vm0, %v965_v9 }
  0x13   :  { %894 = vmatpush3.bf16.msra.mxu1 %v967_v11  ;;  %946 = vmatpush3.bf16.msra.mxu0 %v943_v15 }
  0x14   :  { %948 = vmatprep.subr.bf16.mxu0 %v947_v17 }
  0x17   :  { %950 = vmatpush3.bf16.msra.mxu0 %v947_v17 }
  0xdd   :  { %v877_v19 = vpop.f32.mrb[0].mxu0  ;;  %v885_v20 = vpop.f32.mrb[0].mxu1 }
  0xde   :  { %v179_v21 = vadd.f32 %v877_v19, %v784_v18  ;;  %v170_v22 = vpop.f32.mrb[1].mxu0  ;;  %v211_v23 = vadd.f32 %v885_v20, %v784_v18  ;;  %v202_v24 = vpop.f32.mrb[1].mxu1  ;;  %v803_v19 = vld [vmem:[%s1146_s4] ss:$0 sm:$0xff] }
  0xdf   :  { %v171_v25 = vadd.f32 %v784_v18, %v170_v22  ;;  %v878_v26 = vpop.f32.mrb[2].mxu0  ;;  %v203_v27 = vadd.f32 %v784_v18, %v202_v24  ;;  %v886_v28 = vpop.f32.mrb[2].mxu1 }
  0xe0   :  { %v182_v29 = vadd.f32 %v878_v26, %v784_v18  ;;  %v173_v30 = vpop.f32.mrb[3].mxu0  ;;  %v243_v31 = vmax.f32 %v211_v23, 0.0  ;;  %v214_v32 = vadd.f32 %v886_v28, %v784_v18  ;;  %v205_v33 = vpop.f32.mrb[3].mxu1  ;;  %v235_v37 = vmax.f32 %v179_v21, 0.0 }
  0xe1   :  { %v174_v34 = vadd.f32 %v784_v18, %v173_v30  ;;  %v241_v35 = vmax.f32 %v203_v27, 0.0  ;;  %v206_v36 = vadd.f32 %v784_v18, %v205_v33  ;;  %v233_v40 = vmax.f32 %v171_v25, 0.0 }
  0xe2   :  { %v236_v38 = vmax.f32 %v182_v29, 0.0  ;;  %v244_v39 = vmax.f32 %v214_v32, 0.0 }
  0xe3   :  { %v234_v41 = vmax.f32 %v174_v34, 0.0  ;;  %v242_v42 = vmax.f32 %v206_v36, 0.0 }
  0xe4   :  { %v250_v43 = vpack.c.bf16 %v236_v38, %v235_v37  ;;  %v254_v44 = vpack.c.bf16 %v244_v39, %v243_v31 }
  0xe5   :  { %v249_v45 = vpack.c.bf16 %v234_v41, %v233_v40  ;;  %v881_v46 = vpop.f32.mrb[4].mxu0  ;;  %v253_v47 = vpack.c.bf16 %v242_v42, %v241_v35  ;;  %v889_v48 = vpop.f32.mrb[4].mxu1 }
  0xe6   :  { %258 = vst.msk [vmem:[#allocation2 + $0x8] sm:$0xff] %vm111_vm0, %v250_v43  ;;  %v195_v49 = vadd.f32 %v881_v46, %v784_v18  ;;  %v186_v50 = vpop.f32.mrb[5].mxu0  ;;  %262 = vst.msk [vmem:[#allocation2 + $0x28] sm:$0xff] %vm111_vm0, %v254_v44  ;;  %v227_v51 = vadd.f32 %v889_v48, %v784_v18  ;;  %v218_v52 = vpop.f32.mrb[5].mxu1 }
  0xe7   :  { %257 = vst.msk [vmem:[#allocation2] sm:$0xff] %vm111_vm0, %v249_v45  ;;  %v187_v53 = vadd.f32 %v784_v18, %v186_v50  ;;  %v882_v54 = vpop.f32.mrb[6].mxu0  ;;  %261 = vst.msk [vmem:[#allocation2 + $0x20] sm:$0xff] %vm111_vm0, %v253_v47  ;;  %v219_v55 = vadd.f32 %v784_v18, %v218_v52  ;;  %v890_v56 = vpop.f32.mrb[6].mxu1 }
  0xe8   :  { %v239_v57 = vmax.f32 %v195_v49, 0.0  ;;  %v198_v58 = vadd.f32 %v882_v54, %v784_v18  ;;  %v189_v59 = vpop.f32.mrb[7].mxu0  ;;  %v247_v60 = vmax.f32 %v227_v51, 0.0  ;;  %v230_v61 = vadd.f32 %v890_v56, %v784_v18  ;;  %v221_v62 = vpop.f32.mrb[7].mxu1 }
  0xe9   :  { %v237_v63 = vmax.f32 %v187_v53, 0.0  ;;  %v190_v0 = vadd.f32 %v784_v18, %v189_v59  ;;  %v245_v1 = vmax.f32 %v219_v55, 0.0  ;;  %v222_v2 = vadd.f32 %v784_v18, %v221_v62 }
  0xea   :  { %v240_v3 = vmax.f32 %v198_v58, 0.0  ;;  %v248_v4 = vmax.f32 %v230_v61, 0.0 }
  0xeb   :  { %v238_v5 = vmax.f32 %v190_v0, 0.0  ;;  %v246_v6 = vmax.f32 %v222_v2, 0.0 }
  0xec   :  { %v252_v7 = vpack.c.bf16 %v240_v3, %v239_v57  ;;  %v256_v8 = vpack.c.bf16 %v248_v4, %v247_v60  ;;  %v830_v4 = vld [vmem:[%s1148_s6] ss:$0 sm:$0xff]  ;;  %s992_s6 = smov [#allocation4]  }
  0xed   :  { %v251_v9 = vpack.c.bf16 %v238_v5, %v237_v63  ;;  %v255_v10 = vpack.c.bf16 %v246_v6, %v245_v1  ;;  %v282_v12 = vld [vmem:[#allocation2 + $0x8] sm:$0xff]  ;;  %s776_s10 = sshll.u32 %s992_s6, 4  ;;  %s777_s10 = int_to_ptr.vmem [resolvable:$true] %s776_s10 }
  0xee   :  { %260 = vst.msk [vmem:[#allocation2 + $0x18] sm:$0xff] %vm111_vm0, %v252_v7  ;;  %v281_v11 = vld [vmem:[#allocation2] sm:$0xff]  ;;  %264 = vst.msk [vmem:[#allocation2 + $0x38] sm:$0xff] %vm111_vm0, %v256_v8  ;;  %v286_v16 = vld [vmem:[#allocation2 + $0x28] sm:$0xff]  ;;  %s968_s1 = scalar_lea.vmem %s777_s10, 16  ;;  %s972_s11 = scalar_lea.vmem %s777_s10, 32 }
  0xef   :  { %259 = vst.msk [vmem:[#allocation2 + $0x10] sm:$0xff] %vm111_vm0, %v251_v9  ;;  %895 = vmatprep.mubr.msk.bf16.mxu1 %vm111_vm0, %v281_v11  ;;  %263 = vst.msk [vmem:[#allocation2 + $0x30] sm:$0xff] %vm111_vm0, %v255_v10  ;;  %v285_v15 = vld [vmem:[#allocation2 + $0x20] sm:$0xff]  ;;  %p969_p0 = scmp.ne.s32.totalorder %s777_s10, %s968_s1  ;;  %p973_p1 = scmp.lt.s32.totalorder %s777_s10, %s777_s10 }
  0xf0   :  { %896 = vmatmul.mubr.msk.bf16.vlgmr.msra.gmra.mrb[8].mxu1 %vm111_vm0, %v282_v12  ;;  %p974_p2 = scmp.lt.s32.totalorder %s972_s11, %s968_s1 }
  0xf2   :  { %p975_p3 = por %p974_p2, %p973_p1 }
  0xf4   :  { %p976_p4 = pnand %p975_p3, %p969_p0 }
  0xf5   :  { %v284_v13 = vld [vmem:[#allocation2 + $0x18] sm:$0xff] }
  0xf6   :  { %v283_v14 = vld [vmem:[#allocation2 + $0x10] sm:$0xff]  ;;  %v288_v18 = vld [vmem:[#allocation2 + $0x38] sm:$0xff] }
  0xf7   :  { %899 = vmatprep.mubr.msk.bf16.mxu1 %vm111_vm0, %v283_v14  ;;  %v287_v17 = vld [vmem:[#allocation2 + $0x30] sm:$0xff] }
  0xf8   :  { %900 = vmatmul.mubr.msk.bf16.gmra.mrb[12].mxu1 %vm111_vm0, %v284_v13 }
  0xf9   :  { %903 = vmatprep.mubr.msk.bf16.mxu1 %vm111_vm0, %v285_v15 }
 0x100   :  { %904 = vmatmul.mubr.msk.bf16.gmra.mrb[16].mxu1 %vm111_vm0, %v286_v16 }
 0x101   :  { %907 = vmatprep.mubr.msk.bf16.mxu1 %vm111_vm0, %v287_v17 }
 0x108   :  { %908 = vmatmul.mubr.msk.bf16.gmra.mrb[20].mxu1 %vm111_vm0, %v288_v18 }
 0x1c3   :  { %v897_v20 = vpop.f32.mrb[8].mxu1 }
 0x1c4   :  { %v371_v21 = vpop.f32.mrb[9].mxu1  ;;  %v380_v24 = vadd.f32 %v897_v20, %v803_v19 }
 0x1c5   :  { %v372_v22 = vadd.f32 %v803_v19, %v371_v21  ;;  %v898_v23 = vpop.f32.mrb[10].mxu1 }
 0x1c6   :  { %v374_v25 = vpop.f32.mrb[11].mxu1  ;;  %v383_v28 = vadd.f32 %v898_v23, %v803_v19  ;;  %v436_v30 = vmax.f32 %v380_v24, 0.0 }
 0x1c7   :  { %v434_v26 = vmax.f32 %v372_v22, 0.0  ;;  %v375_v27 = vadd.f32 %v803_v19, %v374_v25 }
 0x1c8   :  { %v437_v34 = vmax.f32 %v383_v28, 0.0 }
 0x1c9   :  { %v435_v29 = vmax.f32 %v375_v27, 0.0  ;;  %919 = vmatprep.mubr.msk.f32.mxu0 %vm111_vm0, %v434_v26 }
 0x1cb   :  { %v901_v31 = vpop.f32.mrb[12].mxu1  ;;  %920 = vmatmul.mubr.msk.f32.vlgmr.msra.gmra.mrb[8].mxu0 %vm111_vm0, %v435_v29 }
 0x1cc   :  { %v396_v32 = vadd.f32 %v901_v31, %v803_v19  ;;  %v387_v33 = vpop.f32.mrb[13].mxu1  ;;  %922 = vmatprep.mubr.msk.f32.mxu0 %vm111_vm0, %v436_v30 }
 0x1cd   :  { %v388_v35 = vadd.f32 %v803_v19, %v387_v33  ;;  %v902_v36 = vpop.f32.mrb[14].mxu1 }
 0x1ce   :  { %v390_v37 = vpop.f32.mrb[15].mxu1  ;;  %v440_v40 = vmax.f32 %v396_v32, 0.0  ;;  %v399_v41 = vadd.f32 %v902_v36, %v803_v19 }
 0x1cf   :  { %v438_v38 = vmax.f32 %v388_v35, 0.0  ;;  %v391_v39 = vadd.f32 %v803_v19, %v390_v37  ;;  %923 = vmatmul.mubr.msk.f32.gmra.mrb[10].mxu0 %vm111_vm0, %v437_v34 }
 0x1d0   :  { %v441_v46 = vmax.f32 %v399_v41, 0.0 }
 0x1d1   :  { %v439_v42 = vmax.f32 %v391_v39, 0.0  ;;  %925 = vmatprep.mubr.msk.f32.mxu0 %vm111_vm0, %v438_v38 }
 0x1d3   :  { %926 = vmatmul.mubr.msk.f32.gmra.mrb[12].mxu0 %vm111_vm0, %v439_v42  ;;  %v905_v43 = vpop.f32.mrb[16].mxu1 }
 0x1d4   :  { %928 = vmatprep.mubr.msk.f32.mxu0 %vm111_vm0, %v440_v40  ;;  %v412_v44 = vadd.f32 %v905_v43, %v803_v19  ;;  %v403_v45 = vpop.f32.mrb[17].mxu1 }
 0x1d5   :  { %v404_v47 = vadd.f32 %v803_v19, %v403_v45  ;;  %v906_v48 = vpop.f32.mrb[18].mxu1 }
 0x1d6   :  { %v406_v49 = vpop.f32.mrb[19].mxu1  ;;  %v415_v51 = vadd.f32 %v906_v48, %v803_v19  ;;  %v444_v53 = vmax.f32 %v412_v44, 0.0 }
 0x1d7   :  { %929 = vmatmul.mubr.msk.f32.gmra.mrb[14].mxu0 %vm111_vm0, %v441_v46  ;;  %v442_v50 = vmax.f32 %v404_v47, 0.0  ;;  %v407_v52 = vadd.f32 %v803_v19, %v406_v49 }
 0x1d8   :  { %v445_v55 = vmax.f32 %v415_v51, 0.0 }
 0x1d9   :  { %v443_v54 = vmax.f32 %v407_v52, 0.0  ;;  %931 = vmatprep.mubr.msk.f32.mxu0 %vm111_vm0, %v442_v50 }
 0x1db   :  { %932 = vmatmul.mubr.msk.f32.gmra.mrb[16].mxu0 %vm111_vm0, %v443_v54  ;;  %v909_v56 = vpop.f32.mrb[20].mxu1 }
 0x1dc   :  { %934 = vmatprep.mubr.msk.f32.mxu0 %vm111_vm0, %v444_v53  ;;  %v428_v57 = vadd.f32 %v909_v56, %v803_v19  ;;  %v419_v58 = vpop.f32.mrb[21].mxu1 }
 0x1dd   :  { %v420_v59 = vadd.f32 %v803_v19, %v419_v58  ;;  %v910_v60 = vpop.f32.mrb[22].mxu1 }
 0x1de   :  { %v422_v61 = vpop.f32.mrb[23].mxu1  ;;  %v431_v63 = vadd.f32 %v910_v60, %v803_v19  ;;  %v448_v1 = vmax.f32 %v428_v57, 0.0 }
 0x1df   :  { %935 = vmatmul.mubr.msk.f32.gmra.mrb[18].mxu0 %vm111_vm0, %v445_v55  ;;  %v446_v62 = vmax.f32 %v420_v59, 0.0  ;;  %v423_v0 = vadd.f32 %v803_v19, %v422_v61 }
 0x1e0   :  { %v449_v3 = vmax.f32 %v431_v63, 0.0 }
 0x1e1   :  { %v447_v2 = vmax.f32 %v423_v0, 0.0  ;;  %937 = vmatprep.mubr.msk.f32.mxu0 %vm111_vm0, %v446_v62 }
 0x1e3   :  { %938 = vmatmul.mubr.msk.f32.gmra.mrb[20].mxu0 %vm111_vm0, %v447_v2 }
 0x1e4   :  { %940 = vmatprep.mubr.msk.f32.mxu0 %vm111_vm0, %v448_v1 }
 0x1e7   :  { %941 = vmatmul.mubr.msk.f32.gmra.mrb[22].mxu0 %vm111_vm0, %v449_v3 }
 0x29e   :  { %v921_v5 = vpop.f32.mrb[8].mxu0 }
 0x29f   :  { %v584_v6 = vpop.f32.mrb[9].mxu0  ;;  %v722_v10 = vadd.f32 %v921_v5, %v830_v4 }
 0x2a0   :  { %v721_v7 = vadd.f32 %v830_v4, %v584_v6 }
 0x2a2   :  { %v924_v8 = vpop.f32.mrb[10].mxu0  ;;  %737 = vxpose.xlu0.b32.start [1/16] (narrow) %v721_v7, 8 }
 0x2a3   :  { %v594_v9 = vpop.f32.mrb[11].mxu0  ;;  %v724_v16 = vadd.f32 %v924_v8, %v830_v4 }
 0x2a4   :  { %v723_v13 = vadd.f32 %v830_v4, %v594_v9 }
 0x2a6   :  { %v927_v11 = vpop.f32.mrb[12].mxu0  ;;  %738 = vxpose.xlu0.b32.cont [2/16] (narrow) %v722_v10, 8 }
 0x2a7   :  { %v604_v12 = vpop.f32.mrb[13].mxu0  ;;  %v726_v22 = vadd.f32 %v927_v11, %v830_v4 }
 0x2a8   :  { %v725_v19 = vadd.f32 %v830_v4, %v604_v12 }
 0x2aa   :  { %v930_v14 = vpop.f32.mrb[14].mxu0  ;;  %739 = vxpose.xlu0.b32.cont [3/16] (narrow) %v723_v13, 8 }
 0x2ab   :  { %v614_v15 = vpop.f32.mrb[15].mxu0  ;;  %v728_v28 = vadd.f32 %v930_v14, %v830_v4 }
 0x2ac   :  { %v727_v25 = vadd.f32 %v830_v4, %v614_v15 }
 0x2ae   :  { %740 = vxpose.xlu0.b32.cont [4/16] (narrow) %v724_v16, 8  ;;  %v933_v17 = vpop.f32.mrb[16].mxu0 }
 0x2af   :  { %v624_v18 = vpop.f32.mrb[17].mxu0  ;;  %v730_v30 = vadd.f32 %v933_v17, %v830_v4 }
 0x2b0   :  { %v729_v29 = vadd.f32 %v830_v4, %v624_v18 }
 0x2b2   :  { %741 = vxpose.xlu0.b32.cont [5/16] (narrow) %v725_v19, 8  ;;  %v936_v20 = vpop.f32.mrb[18].mxu0 }
 0x2b3   :  { %v634_v21 = vpop.f32.mrb[19].mxu0  ;;  %v732_v32 = vadd.f32 %v936_v20, %v830_v4 }
 0x2b4   :  { %v731_v31 = vadd.f32 %v830_v4, %v634_v21 }
 0x2b6   :  { %742 = vxpose.xlu0.b32.cont [6/16] (narrow) %v726_v22, 8  ;;  %v939_v23 = vpop.f32.mrb[20].mxu0 }
 0x2b7   :  { %v644_v24 = vpop.f32.mrb[21].mxu0  ;;  %v734_v34 = vadd.f32 %v939_v23, %v830_v4 }
 0x2b8   :  { %v733_v33 = vadd.f32 %v830_v4, %v644_v24 }
 0x2ba   :  { %743 = vxpose.xlu0.b32.cont [7/16] (narrow) %v727_v25, 8  ;;  %v942_v26 = vpop.f32.mrb[22].mxu0 }
 0x2bb   :  { %v654_v27 = vpop.f32.mrb[23].mxu0  ;;  %v736_v36 = vadd.f32 %v942_v26, %v830_v4 }
 0x2bc   :  { %v735_v35 = vadd.f32 %v830_v4, %v654_v27 }
 0x2be   :  { %744 = vxpose.xlu0.b32.cont [8/16] (narrow) %v728_v28, 8 }
 0x2c2   :  { %745 = vxpose.xlu0.b32.cont [9/16] (narrow) %v729_v29, 8 }
 0x2c6   :  { %746 = vxpose.xlu0.b32.cont [10/16] (narrow) %v730_v30, 8 }
 0x2ca   :  { %747 = vxpose.xlu0.b32.cont [11/16] (narrow) %v731_v31, 8 }
 0x2ce   :  { %748 = vxpose.xlu0.b32.cont [12/16] (narrow) %v732_v32, 8 }
 0x2d2   :  { %749 = vxpose.xlu0.b32.cont [13/16] (narrow) %v733_v33, 8 }
 0x2d6   :  { %750 = vxpose.xlu0.b32.cont [14/16] (narrow) %v734_v34, 8 }
 0x2da   :  { %751 = vxpose.xlu0.b32.cont [15/16] (narrow) %v735_v35, 8 }
 0x2de   :  { %752 = vxpose.xlu0.b32.end [16/16] (narrow) %v736_v36, 8 }
 0x322   :  { %v753_v37 = vpop.trf.xlu0 }
 0x323   :  { %769 = vst [vmem:[#allocation4] sm:$0x1] %v753_v37 }
 0x324   :  { %979 = shalt.err (!%p976_p4)
}
 0x325   :  { %s980_s14 = scalar_lea.hbm %s1149_s7, 16 }
 0x326   :  { %p981_p5 = scmp.ne.s32.totalorder %s1149_s7, %s980_s14  ;;  %p984_p6 = scmp.lt.u32.totalorder %s980_s14, %s1149_s7 }
 0x328   :  { %p986_p7 = pnand %p984_p6, %p981_p5 }
 0x32a   :  { %989 = shalt.err (!%p986_p7)
}
 0x32b   :  { %779 = dma.vmem_to_hbm [thread:$0]  %s777_s10, 16, %s1149_s7, [#allocation5]  }
 0x32c   :  { %990 = dma.done.wait [#allocation5], 16  }
 0x32d   :  { %991 = vsyncadd [#allocation5], 4294967280 }
 0x32e   :  { %783 = vsyncpa [#allocation5], 1 }

</bundles_post_ra>
